<compile_context>
chip_gen: v6e
topology: v6e:2x2x1
jax: 0.10.0
libtpu: 0.0.40
codegen_flags: <defaults>
</compile_context>

<pallas_src>
import jax
import jax.numpy as jnp
from jax.experimental import pallas as pl
from jax.experimental.pallas import tpu as pltpu

INPUT_SIZE = 64
HIDDEN_SIZE = 64
ACTION_SIZE = 65
HEAD_PAD = 128            # policy (65) + value (1) padded to a full 128-lane slab
VALUE_COL = ACTION_SIZE   # column 65 of the fused head output holds the value


def _round_up(n, m):
    return ((n + m - 1) // m) * m


def _pick_tile_m(batch, tile_m):
    """Sublane-aligned batch tile; guarantees >=2 grid steps when there is more
    than one 8-row tile of work (so v7x's two TensorCores both get work)."""
    tm = min(tile_m, _round_up(batch, 8))
    if batch > 8 and pl.cdiv(batch, tm) < 2:
        tm = max(8, _round_up(pl.cdiv(batch, 2), 8))
    return tm


def _pvn_kernel(x_ref, w1_ref, b1_ref, w2_ref, b2_ref, wh_ref, bh_ref, out_ref):
    w_dtype = w1_ref.dtype
    # f32 tile from HBM -> bf16 for the MXU (cast happens in-kernel; no extra
    # wrapper-side HBM convert pass).
    x = x_ref[...].astype(w_dtype)                               # (TM, 64)

    # shared1 + ReLU (f32 accumulation)
    h1 = jnp.dot(x, w1_ref[...], preferred_element_type=jnp.float32) + b1_ref[...]
    h1 = jnp.maximum(h1, 0.0).astype(w_dtype)

    # shared2 + ReLU
    h2 = jnp.dot(h1, w2_ref[...], preferred_element_type=jnp.float32) + b2_ref[...]
    h2 = jnp.maximum(h2, 0.0).astype(w_dtype)

    # fused policy+value heads -> lane-dense (TM, 128) slab
    heads = jnp.dot(h2, wh_ref[...], preferred_element_type=jnp.float32) + bh_ref[...]

    # In-kernel tanh on the value column only (EUP/VPU slots are free under the
    # DMA/MXU bottleneck); saves a separate XLA pass over the output slab.
    col = jax.lax.broadcasted_iota(jnp.int32, heads.shape, dimension=1)
    heads = jnp.where(col == VALUE_COL, jnp.tanh(heads), heads)

    out_ref[...] = heads.astype(out_ref.dtype)


def policy_value_forward(x, packed_params, *, tile_m=4096, out_dtype=jnp.float32):
    """x: (B, 64) -> (policy_logits (B, 65), value (B, 1)), both out_dtype."""
    w1, b1, w2, b2, wh, bh = packed_params
    B = x.shape[0]
    x = jnp.asarray(x, jnp.float32)          # stays f32; bf16 cast is in-kernel

    tm = _pick_tile_m(B, tile_m)
    grid = (pl.cdiv(B, tm),)                 # partial last tile is masked by Pallas

    w_bytes = jnp.dtype(w1.dtype).itemsize
    out_bytes = jnp.dtype(out_dtype).itemsize
    weight_bytes = (
        (INPUT_SIZE * HIDDEN_SIZE + HIDDEN_SIZE * HIDDEN_SIZE + HIDDEN_SIZE * HEAD_PAD)
        * w_bytes
        + (HIDDEN_SIZE + HIDDEN_SIZE + HEAD_PAD) * 4
    )
    cost = pl.CostEstimate(
        flops=2 * B * (INPUT_SIZE * HIDDEN_SIZE
                       + HIDDEN_SIZE * HIDDEN_SIZE
                       + HIDDEN_SIZE * HEAD_PAD),
        transcendentals=B,                    # one tanh per row (value column)
        bytes_accessed=B * INPUT_SIZE * 4 + B * HEAD_PAD * out_bytes + weight_bytes,
    )

    fused = pl.pallas_call(
        _pvn_kernel,
        out_shape=jax.ShapeDtypeStruct((B, HEAD_PAD), out_dtype),
        grid_spec=pltpu.PrefetchScalarGridSpec(
            num_scalar_prefetch=0,
            grid=grid,
            in_specs=[
                pl.BlockSpec((tm, INPUT_SIZE), lambda i: (i, 0)),            # x tile (f32)
                pl.BlockSpec((INPUT_SIZE, HIDDEN_SIZE), lambda i: (0, 0)),   # w1 (resident)
                pl.BlockSpec((1, HIDDEN_SIZE), lambda i: (0, 0)),            # b1
                pl.BlockSpec((HIDDEN_SIZE, HIDDEN_SIZE), lambda i: (0, 0)),  # w2
                pl.BlockSpec((1, HIDDEN_SIZE), lambda i: (0, 0)),            # b2
                pl.BlockSpec((HIDDEN_SIZE, HEAD_PAD), lambda i: (0, 0)),     # fused heads W
                pl.BlockSpec((1, HEAD_PAD), lambda i: (0, 0)),               # fused heads b
            ],
            out_specs=pl.BlockSpec((tm, HEAD_PAD), lambda i: (i, 0)),
        ),
        compiler_params=pltpu.CompilerParams(
            dimension_semantics=("parallel",),   # batch tiles shard across v7x's 2 TCs
        ),
        cost_estimate=cost,
    )(x, w1, b1, w2, b2, wh, bh)

    # Cheap slices of the lane-dense slab (tanh already applied in-kernel).
    policy_logits = fused[:, :ACTION_SIZE]
    value = fused[:, VALUE_COL:VALUE_COL + 1]
    return policy_logits, value


# ----------------------------------------------------------------------------
# Parameter construction (matches the PyTorch module's init) and packing.
# ----------------------------------------------------------------------------
def xavier_uniform(key, fan_in, fan_out, dtype=jnp.float32):
    """Matches torch.nn.init.xavier_uniform_ (gain=1); stored as (in, out)."""
    bound = jnp.sqrt(6.0 / (fan_in + fan_out))
    return jax.random.uniform(key, (fan_in, fan_out), dtype=dtype,
                              minval=-bound, maxval=bound)


def init_params(key):
    k1, k2, k3, k4 = jax.random.split(key, 4)
    w1 = xavier_uniform(k1, INPUT_SIZE, HIDDEN_SIZE)
    b1 = jnp.zeros((1, HIDDEN_SIZE), jnp.float32)
    w2 = xavier_uniform(k2, HIDDEN_SIZE, HIDDEN_SIZE)
    b2 = jnp.zeros((1, HIDDEN_SIZE), jnp.float32)
    wp = xavier_uniform(k3, HIDDEN_SIZE, ACTION_SIZE)
    bp = jnp.zeros((1, ACTION_SIZE), jnp.float32)
    wv = xavier_uniform(k4, HIDDEN_SIZE, 1)
    bv = jnp.zeros((1, 1), jnp.float32)
    return (w1, b1, w2, b2, wp, bp, wv, bv)


def pack_params(params, compute_dtype=jnp.bfloat16):
    """Fuse policy/value head weights into one zero-padded (64, 128) slab and
    pre-cast matmul weights to the compute dtype (biases stay f32)."""
    w1, b1, w2, b2, wp, bp, wv, bv = params
    wh = jnp.zeros((HIDDEN_SIZE, HEAD_PAD), jnp.float32)
    wh = wh.at[:, :ACTION_SIZE].set(wp)
    wh = wh.at[:, VALUE_COL:VALUE_COL + 1].set(wv)
    bh = jnp.zeros((1, HEAD_PAD), jnp.float32)
    bh = bh.at[:, :ACTION_SIZE].set(bp)
    bh = bh.at[:, VALUE_COL:VALUE_COL + 1].set(bv)
    return (w1.astype(compute_dtype), b1,
            w2.astype(compute_dtype), b2,
            wh.astype(compute_dtype), bh)


# ----------------------------------------------------------------------------
# References.
# ----------------------------------------------------------------------------
def reference_forward(x, params):
    """Pure-JAX f32 reference of the PyTorch forward pass."""
    w1, b1, w2, b2, wp, bp, wv, bv = params
    h = jnp.maximum(x @ w1 + b1, 0.0)
    h = jnp.maximum(h @ w2 + b2, 0.0)
    policy = h @ wp + bp
    value = jnp.tanh(h @ wv + bv)
    return policy, value


def reference_forward_lowp(x, packed_params):
    """Pure-JAX reference mirroring the kernel's bf16-operand / f32-accum path."""
    w1, b1, w2, b2, wh, bh = packed_params
    xb = x.astype(w1.dtype)
    h = jnp.maximum(jnp.dot(xb, w1, preferred_element_type=jnp.float32) + b1, 0.0)
    h = h.astype(w1.dtype)
    h = jnp.maximum(jnp.dot(h, w2, preferred_element_type=jnp.float32) + b2, 0.0)
    h = h.astype(w1.dtype)
    heads = jnp.dot(h, wh, preferred_element_type=jnp.float32) + bh
    return heads[:, :ACTION_SIZE], jnp.tanh(heads[:, VALUE_COL:VALUE_COL + 1])


if __name__ == "__main__":
    key = jax.random.PRNGKey(0)
    pkey, xkey, xkey2 = jax.random.split(key, 3)

    params = init_params(pkey)
    packed = pack_params(params)           # one-time pack: fused heads + bf16 cast

    # --- small serving-style batch (single grid step) ---
    batch = 8
    x = jax.random.normal(xkey, (batch, INPUT_SIZE), dtype=jnp.float32)

    policy_logits, value = policy_value_forward(x, packed)
    jax.block_until_ready((policy_logits, value))

    assert policy_logits.shape == (batch, ACTION_SIZE)
    assert value.shape == (batch, 1)

    lp_policy, lp_value = reference_forward_lowp(x, packed)
    assert jnp.allclose(policy_logits, lp_policy, atol=2e-2, rtol=2e-2)
    assert jnp.allclose(value, lp_value, atol=2e-2, rtol=2e-2)

    ref_policy, ref_value = reference_forward(x, params)
    assert jnp.allclose(policy_logits, ref_policy, atol=8e-2, rtol=8e-2)
    assert jnp.allclose(value, ref_value, atol=8e-2, rtol=8e-2)

    # --- uneven batch, multi-step grid (exercises cdiv grid + masked last tile
    #     + the >=2-step split used for v7x dual-TensorCore sharding) ---
    batch2 = 300
    x2 = jax.random.normal(xkey2, (batch2, INPUT_SIZE), dtype=jnp.float32)
    p2, v2 = policy_value_forward(x2, packed, tile_m=128)
    jax.block_until_ready((p2, v2))
    assert p2.shape == (batch2, ACTION_SIZE) and v2.shape == (batch2, 1)
    lp_p2, lp_v2 = reference_forward_lowp(x2, packed)
    assert jnp.allclose(p2, lp_p2, atol=2e-2, rtol=2e-2)
    assert jnp.allclose(v2, lp_v2, atol=2e-2, rtol=2e-2)

    print("KERNEL_OK")
</pallas_src>

<mosaic_0001>
module attributes {stable_mosaic.version = 11 : i64} {
  func.func @_pvn_kernel(%arg0: i32, %arg1: memref<8x64xf32, #tpu.memory_space<vmem>>, %arg2: memref<64x64xbf16, #tpu.memory_space<vmem>>, %arg3: memref<1x64xf32, #tpu.memory_space<vmem>>, %arg4: memref<64x64xbf16, #tpu.memory_space<vmem>>, %arg5: memref<1x64xf32, #tpu.memory_space<vmem>>, %arg6: memref<64x128xbf16, #tpu.memory_space<vmem>>, %arg7: memref<1x128xf32, #tpu.memory_space<vmem>>, %arg8: memref<8x128xf32, #tpu.memory_space<vmem>>) attributes {dimension_semantics = [#tpu.dimension_semantics<parallel>], iteration_bounds = array<i64: 1>, scalar_prefetch = 0 : i64, scratch_operands = 0 : i64, tpu.core_type = #tpu.core_type<tc>, window_params = [{transform_indices = @transform_0, window_bounds = array<i64: 8, 64>}, {pipeline_mode = #tpu.pipeline_mode<synchronous>, transform_indices = @transform_1, window_bounds = array<i64: 64, 64>}, {pipeline_mode = #tpu.pipeline_mode<synchronous>, transform_indices = @transform_2, window_bounds = array<i64: 1, 64>}, {pipeline_mode = #tpu.pipeline_mode<synchronous>, transform_indices = @transform_3, window_bounds = array<i64: 64, 64>}, {pipeline_mode = #tpu.pipeline_mode<synchronous>, transform_indices = @transform_4, window_bounds = array<i64: 1, 64>}, {pipeline_mode = #tpu.pipeline_mode<synchronous>, transform_indices = @transform_5, window_bounds = array<i64: 64, 128>}, {pipeline_mode = #tpu.pipeline_mode<synchronous>, transform_indices = @transform_6, window_bounds = array<i64: 1, 128>}, {transform_indices = @transform_7, window_bounds = array<i64: 8, 128>}]} {
    %c0 = arith.constant 0 : index
    %c0_0 = arith.constant 0 : index
    %0 = vector.load %arg1[%c0, %c0_0] : memref<8x64xf32, #tpu.memory_space<vmem>>, vector<8x64xf32>
    %1 = arith.truncf %0 : vector<8x64xf32> to vector<8x64xbf16>
    %c0_1 = arith.constant 0 : index
    %c0_2 = arith.constant 0 : index
    %2 = vector.load %arg2[%c0_1, %c0_2] : memref<64x64xbf16, #tpu.memory_space<vmem>>, vector<64x64xbf16>
    %cst = arith.constant dense<0.000000e+00> : vector<8x64xf32>
    %3 = tpu.matmul %1, %2, %cst {dimension_numbers = #tpu.dot_dimension_numbers<[1], [0], [0], [1], [0, 0, 1, 1], [], []>} : vector<8x64xbf16>, vector<64x64xbf16>, vector<8x64xf32> -> vector<8x64xf32>
    %c0_3 = arith.constant 0 : index
    %c0_4 = arith.constant 0 : index
    %4 = vector.load %arg3[%c0_3, %c0_4] : memref<1x64xf32, #tpu.memory_space<vmem>>, vector<1x64xf32>
    %5 = vector.broadcast %4 : vector<1x64xf32> to vector<8x64xf32>
    %6 = arith.addf %3, %5 : vector<8x64xf32>
    %cst_5 = arith.constant 0.000000e+00 : f32
    %7 = vector.broadcast %cst_5 : f32 to vector<8x64xf32>
    %8 = arith.maximumf %6, %7 : vector<8x64xf32>
    %9 = arith.truncf %8 : vector<8x64xf32> to vector<8x64xbf16>
    %c0_6 = arith.constant 0 : index
    %c0_7 = arith.constant 0 : index
    %10 = vector.load %arg4[%c0_6, %c0_7] : memref<64x64xbf16, #tpu.memory_space<vmem>>, vector<64x64xbf16>
    %cst_8 = arith.constant dense<0.000000e+00> : vector<8x64xf32>
    %11 = tpu.matmul %9, %10, %cst_8 {dimension_numbers = #tpu.dot_dimension_numbers<[1], [0], [0], [1], [0, 0, 1, 1], [], []>} : vector<8x64xbf16>, vector<64x64xbf16>, vector<8x64xf32> -> vector<8x64xf32>
    %c0_9 = arith.constant 0 : index
    %c0_10 = arith.constant 0 : index
    %12 = vector.load %arg5[%c0_9, %c0_10] : memref<1x64xf32, #tpu.memory_space<vmem>>, vector<1x64xf32>
    %13 = vector.broadcast %12 : vector<1x64xf32> to vector<8x64xf32>
    %14 = arith.addf %11, %13 : vector<8x64xf32>
    %cst_11 = arith.constant 0.000000e+00 : f32
    %15 = vector.broadcast %cst_11 : f32 to vector<8x64xf32>
    %16 = arith.maximumf %14, %15 : vector<8x64xf32>
    %17 = arith.truncf %16 : vector<8x64xf32> to vector<8x64xbf16>
    %c0_12 = arith.constant 0 : index
    %c0_13 = arith.constant 0 : index
    %18 = vector.load %arg6[%c0_12, %c0_13] : memref<64x128xbf16, #tpu.memory_space<vmem>>, vector<64x128xbf16>
    %cst_14 = arith.constant dense<0.000000e+00> : vector<8x128xf32>
    %19 = tpu.matmul %17, %18, %cst_14 {dimension_numbers = #tpu.dot_dimension_numbers<[1], [0], [0], [1], [0, 0, 1, 1], [], []>} : vector<8x64xbf16>, vector<64x128xbf16>, vector<8x128xf32> -> vector<8x128xf32>
    %c0_15 = arith.constant 0 : index
    %c0_16 = arith.constant 0 : index
    %20 = vector.load %arg7[%c0_15, %c0_16] : memref<1x128xf32, #tpu.memory_space<vmem>>, vector<1x128xf32>
    %21 = vector.broadcast %20 : vector<1x128xf32> to vector<8x128xf32>
    %22 = arith.addf %19, %21 : vector<8x128xf32>
    %23 = tpu.iota {dimensions = array<i32: 1>} : vector<8x128xi32>
    %c65_i32 = arith.constant 65 : i32
    %24 = vector.broadcast %c65_i32 : i32 to vector<8x128xi32>
    %25 = arith.cmpi eq, %23, %24 : vector<8x128xi32>
    %26 = math.tanh %22 : vector<8x128xf32>
    %27 = arith.select %25, %26, %22 : vector<8x128xi1>, vector<8x128xf32>
    %c0_17 = arith.constant 0 : index
    %c0_18 = arith.constant 0 : index
    %28 = vector.load %arg8[%c0_17, %c0_18] : memref<8x128xf32, #tpu.memory_space<vmem>>, vector<8x128xf32>
    tpu.vector_store %arg8[%c0_17, %c0_18], %27 {strides = array<i32>} : memref<8x128xf32, #tpu.memory_space<vmem>>, vector<8x128xf32>,
    return
  }
  func.func @transform_0(%arg0: i32) -> (i32, i32) {
    %c0_i32 = arith.constant 0 : i32
    %c0_i32_0 = arith.constant 0 : i32
    return %arg0, %c0_i32 : i32, i32
  }
  func.func @transform_1(%arg0: i32) -> (i32, i32) {
    %c0_i32 = arith.constant 0 : i32
    %c0_i32_0 = arith.constant 0 : i32
    %c0_i32_1 = arith.constant 0 : i32
    return %c0_i32, %c0_i32_0 : i32, i32
  }
  func.func @transform_2(%arg0: i32) -> (i32, i32) {
    %c0_i32 = arith.constant 0 : i32
    %c0_i32_0 = arith.constant 0 : i32
    %c0_i32_1 = arith.constant 0 : i32
    return %c0_i32, %c0_i32_0 : i32, i32
  }
  func.func @transform_3(%arg0: i32) -> (i32, i32) {
    %c0_i32 = arith.constant 0 : i32
    %c0_i32_0 = arith.constant 0 : i32
    %c0_i32_1 = arith.constant 0 : i32
    return %c0_i32, %c0_i32_0 : i32, i32
  }
  func.func @transform_4(%arg0: i32) -> (i32, i32) {
    %c0_i32 = arith.constant 0 : i32
    %c0_i32_0 = arith.constant 0 : i32
    %c0_i32_1 = arith.constant 0 : i32
    return %c0_i32, %c0_i32_0 : i32, i32
  }
  func.func @transform_5(%arg0: i32) -> (i32, i32) {
    %c0_i32 = arith.constant 0 : i32
    %c0_i32_0 = arith.constant 0 : i32
    %c0_i32_1 = arith.constant 0 : i32
    return %c0_i32, %c0_i32_0 : i32, i32
  }
  func.func @transform_6(%arg0: i32) -> (i32, i32) {
    %c0_i32 = arith.constant 0 : i32
    %c0_i32_0 = arith.constant 0 : i32
    %c0_i32_1 = arith.constant 0 : i32
    return %c0_i32, %c0_i32_0 : i32, i32
  }
  func.func @transform_7(%arg0: i32) -> (i32, i32) {
    %c0_i32 = arith.constant 0 : i32
    %c0_i32_0 = arith.constant 0 : i32
    return %arg0, %c0_i32 : i32, i32
  }
}

</mosaic_0001>

<bundles_post_ra>
// kernel: tpu_custom_call.1
= control target key start
LH: loop header
LB: loop body
LE: loop exit
PB: predicated region body
PF: predicated region fallthrough
CT: control target
= control target key end

     0   :  { %12 = vsyncpa [#allocation3], 0  ;;  %s645_s0 = inlined_call_operand.hbm [shape: f32[8,64], index: 0, kind: input, shape index: {}]   ;;  %s646_s1 = inlined_call_operand.hbm [shape: bf16[64,64], index: 1, kind: input, shape index: {}]   ;;  %s647_s2 = inlined_call_operand.vmem [shape: f32[1,64], index: 2, kind: input, shape index: {}]   ;;  %s648_s3 = inlined_call_operand.hbm [shape: bf16[64,64], index: 3, kind: input, shape index: {}]   ;;  %s649_s4 = inlined_call_operand.vmem [shape: f32[1,64], index: 4, kind: input, shape index: {}]   ;;  %s650_s5 = inlined_call_operand.hbm [shape: bf16[64,128], index: 5, kind: input, shape index: {}]   ;;  %s651_s6 = inlined_call_operand.vmem [shape: f32[1,128], index: 6, kind: input, shape index: {}]   ;;  %s652_s7 = inlined_call_operand.hbm [shape: f32[8,128], index: 7, kind: output, shape index: {}]  }
   0x1   :  { %13 = vsyncpa [#allocation6], 0 }
   0x2   :  { %14 = vsyncpa [#allocation9], 0 }
   0x3   :  { %15 = vsyncpa [#allocation4], 0  ;;  %s557_s24 = smov [#allocation5]  }
   0x4   :  { %s31_s25 = sshll.u32 %s557_s24, 4  ;;  %s32_s25 = int_to_ptr.vmem [resolvable:$true] %s31_s25 }
   0x5   :  { %s457_s26 = scalar_lea.vmem %s32_s25, 512  ;;  %p462_p1 = scmp.lt.s32.totalorder %s32_s25, %s32_s25 }
   0x6   :  { %p458_p0 = scmp.ne.s32.totalorder %s32_s25, %s457_s26  ;;  %p463_p2 = scmp.lt.s32.totalorder %s457_s26, %s457_s26 }
   0x8   :  { %p464_p3 = por %p463_p2, %p462_p1 }
   0xa   :  { %p465_p4 = pnand %p464_p3, %p458_p0 }
   0xc   :  { %468 = shalt.err (!%p465_p4)
}
   0xd   :  { %s558_s27 = smov 64   ;;  %s559_s28 = smov 4  }
   0xe   :  { %37 = dma.hbm_to_vmem [thread:$0]  %s646_s1, 512, %s32_s25, [#allocation6], %s558_s27, %s558_s27, %s559_s28  }
   0xf   :  { %s560_s8 = smov [#allocation2]   ;;  %s561_s10 = smov [#allocation7]  }
  0x10   :  { %s22_s9 = sshll.u32 %s560_s8, 4  ;;  %s45_s11 = sshll.u32 %s561_s10, 4  ;;  %s23_s9 = int_to_ptr.vmem [resolvable:$true] %s22_s9  ;;  %s46_s11 = int_to_ptr.vmem [resolvable:$true] %s45_s11 }
  0x11   :  { %s477_s12 = scalar_lea.vmem %s23_s9, 128  ;;  %p482_p6 = scmp.lt.s32.totalorder %s23_s9, %s23_s9 }
  0x12   :  { %p478_p5 = scmp.ne.s32.totalorder %s23_s9, %s477_s12  ;;  %p483_p7 = scmp.lt.s32.totalorder %s477_s12, %s477_s12 }
  0x14   :  { %p484_p8 = por %p483_p7, %p482_p6 }
  0x16   :  { %p485_p9 = pnand %p484_p8, %p478_p5 }
  0x18   :  { %488 = shalt.err (!%p485_p9)
}
  0x19   :  { %25 = dma.hbm_to_vmem [thread:$0]  %s645_s0, 128, %s23_s9, [#allocation3]  }
  0x1a   :  { %s497_s15 = scalar_lea.vmem %s46_s11, 512  ;;  %p502_p11 = scmp.lt.s32.totalorder %s46_s11, %s46_s11 }
  0x1b   :  { %p498_p10 = scmp.ne.s32.totalorder %s46_s11, %s497_s15  ;;  %p503_p12 = scmp.lt.s32.totalorder %s497_s15, %s497_s15 }
  0x1d   :  { %p504_p13 = por %p503_p12, %p502_p11 }
  0x1f   :  { %p505_p0 = pnand %p504_p13, %p498_p10 }
  0x21   :  { %508 = shalt.err (!%p505_p0)
}
  0x22   :  { %51 = dma.hbm_to_vmem [thread:$0]  %s648_s3, 512, %s46_s11, [#allocation6], %s558_s27, %s558_s27, %s559_s28  }
  0x23   :  { %s562_s17 = smov [#allocation8]  }
  0x24   :  { %s59_s18 = sshll.u32 %s562_s17, 4  ;;  %s60_s18 = int_to_ptr.vmem [resolvable:$true] %s59_s18 }
  0x25   :  { %s517_s19 = scalar_lea.vmem %s60_s18, 512  ;;  %p522_p2 = scmp.lt.s32.totalorder %s60_s18, %s60_s18 }
  0x26   :  { %p518_p1 = scmp.ne.s32.totalorder %s60_s18, %s517_s19  ;;  %p523_p3 = scmp.lt.s32.totalorder %s517_s19, %s517_s19 }
  0x28   :  { %p524_p4 = por %p523_p3, %p522_p2 }
  0x2a   :  { %p525_p5 = pnand %p524_p4, %p518_p1 }
  0x2c   :  { %528 = shalt.err (!%p525_p5)
}
  0x2d   :  { %65 = dma.hbm_to_vmem [thread:$0]  %s650_s5, 512, %s60_s18, [#allocation9], %s558_s27, %s558_s27, %s559_s28  }
  0x2e   :  { %549 = dma.done.wait [#allocation3], 128  }
  0x2f   :  { %550 = vsyncadd [#allocation3], 4294967168 }
  0x30   :  { %551 = dma.done.wait [#allocation6], 1024  }
  0x31   :  { %552 = vsyncadd [#allocation6], 4294966272 }
  0x32   :  { %553 = dma.done.wait [#allocation9], 512  }
  0x33   :  { %554 = vsyncadd [#allocation9], 4294966784  ;;  %v563_v0 = vmov 0.0   ;;  %vm564_vm0 = vmmov 0   ;;  %v435_v1 = vld [vmem:[#allocation5 + $0x18] sm:$0xff]   ;;  %v436_v2 = vld [vmem:[#allocation5 + $0x10] sm:$0xff]   ;;  %v334_v37 = vlaneseq }
  0x34   :  { %390 = vmatprep.subr.bf16.mxu0 %v563_v0  ;;  %398 = vmatprep.mubr.msk.bf16.mxu0 %vm564_vm0, %v563_v0  ;;  %v439_v3 = vld [vmem:[#allocation7 + $0x18] sm:$0xff]   ;;  %v437_v4 = vld [vmem:[#allocation5 + $0x8] sm:$0xff]   ;;  %v440_v5 = vld [vmem:[#allocation7 + $0x10] sm:$0xff]   ;;  %vm122_vm1 = vcmask 523264  }
  0x35   :  { %402 = vmatprep.subr.bf16.mxu1 %v563_v0  ;;  %410 = vmatprep.mubr.msk.bf16.mxu1 %vm564_vm0, %v563_v0  ;;  %v438_v6 = vld [vmem:[#allocation5] sm:$0xff]   ;;  %v81_v7 = vld [vmem:[#allocation2] sm:$0xff]  ;;  %v441_v9 = vld [vmem:[#allocation7 + $0x8] sm:$0xff]   ;;  %v335_v38 = vand.u32 127, %v334_v37 }
  0x36   :  { %391 = vmatpush3.bf16.msra.mxu0 %v435_v1  ;;  %403 = vmatpush3.bf16.msra.mxu1 %v439_v3  ;;  %v82_v8 = vpack.c.bf16 %v81_v7, %v81_v7  ;;  %v442_v10 = vld [vmem:[#allocation7] sm:$0xff]   ;;  %v443_v11 = vld [vmem:[#allocation8 + $0x18] sm:$0xff]   ;;  %v444_v12 = vld [vmem:[#allocation8 + $0x10] sm:$0xff]  }
  0x37   :  { %392 = vmatprep.subr.bf16.mxu0 %v563_v0  ;;  %404 = vmatprep.subr.bf16.mxu1 %v563_v0  ;;  %v357_v13 = vld [vmem:[%s647_s2] ss:$0 sm:$0xff]  ;;  %v445_v21 = vld [vmem:[#allocation8 + $0x8] sm:$0xff]   ;;  %v446_v22 = vld [vmem:[#allocation8] sm:$0xff]   ;;  %vm336_vm2 = vcmp.eq.s32.totalorder %v335_v38, 65 }
  0x38   :  { %v363_v23 = vld [vmem:[%s649_s4] ss:$0 sm:$0xff]  ;;  %s565_s4 = smov [#allocation10]  }
  0x39   :  { %v369_v31 = vld [vmem:[%s651_s6] ss:$0 sm:$0xff]  ;;  %s346_s24 = sshll.u32 %s565_s4, 4  ;;  %s347_s24 = int_to_ptr.vmem [resolvable:$true] %s346_s24 }
  0x3a   :  { %393 = vmatpush3.bf16.msra.mxu0 %v436_v2  ;;  %405 = vmatpush3.bf16.msra.mxu1 %v440_v5  ;;  %s529_s25 = scalar_lea.vmem %s347_s24, 128  ;;  %p534_p7 = scmp.lt.s32.totalorder %s347_s24, %s347_s24 }
  0x3b   :  { %394 = vmatprep.subr.bf16.mxu0 %v563_v0  ;;  %406 = vmatprep.subr.bf16.mxu1 %v563_v0  ;;  %p530_p6 = scmp.ne.s32.totalorder %s347_s24, %s529_s25  ;;  %p535_p8 = scmp.lt.s32.totalorder %s529_s25, %s529_s25 }
  0x3d   :  { %p536_p9 = por %p535_p8, %p534_p7 }
  0x3e   :  { %395 = vmatpush3.bf16.msra.mxu0 %v437_v4  ;;  %407 = vmatpush3.bf16.msra.mxu1 %v441_v9 }
  0x3f   :  { %396 = vmatprep.subr.bf16.mxu0 %v563_v0  ;;  %408 = vmatprep.subr.bf16.mxu1 %v563_v0  ;;  %p537_p10 = pnand %p536_p9, %p530_p6 }
  0x42   :  { %397 = vmatpush3.bf16.msra.mxu0 %v438_v6  ;;  %409 = vmatpush3.bf16.msra.mxu1 %v442_v10 }
  0x43   :  { %414 = vmatprep.subr.bf16.mxu0 %v563_v0 }
  0x45   :  { %399 = vmatmul.mubr.msk.bf16.vlgmr.msra.gmra.mxu0 %vm122_vm1, %v82_v8 }
  0x46   :  { %422 = vmatprep.mubr.msk.bf16.mxu0 %vm564_vm0, %v563_v0  ;;  %415 = vmatpush3.bf16.msra.mxu0 %v443_v11 }
  0x47   :  { %416 = vmatprep.subr.bf16.mxu0 %v563_v0 }
  0x4a   :  { %417 = vmatpush3.bf16.msra.mxu0 %v444_v12 }
  0x4b   :  { %418 = vmatprep.subr.bf16.mxu0 %v563_v0 }
  0x4e   :  { %419 = vmatpush3.bf16.msra.mxu0 %v445_v21 }
  0x4f   :  { %420 = vmatprep.subr.bf16.mxu0 %v563_v0 }
  0x52   :  { %421 = vmatpush3.bf16.msra.mxu0 %v446_v22 }
 0x105   :  { %v160_v14 = vpop.f32.mrf.mxu0 }
 0x106   :  { %v161_v15 = vadd.f32 %v357_v13, %v160_v14 }
 0x107   :  { %v400_v16 = vpop.f32.mrf.mxu0 }
 0x108   :  { %v166_v17 = vmax.f32 %v161_v15, 0.0 }
 0x109   :  { %v163_v18 = vpop.f32.mrf.mxu0 }
 0x10a   :  { %v167_v19 = vpack.c.bf16 %v166_v17, %v166_v17 }
 0x10b   :  { %v401_v20 = vpop.f32.mrf.mxu0 }
 0x10c   :  { %411 = vmatmul.mubr.msk.bf16.vlgmr.msra.gmra.mxu1 %vm122_vm1, %v167_v19 }
 0x1cc   :  { %v244_v24 = vpop.f32.mrf.mxu1 }
 0x1cd   :  { %v245_v25 = vadd.f32 %v363_v23, %v244_v24 }
 0x1ce   :  { %v412_v26 = vpop.f32.mrf.mxu1 }
 0x1cf   :  { %v250_v27 = vmax.f32 %v245_v25, 0.0 }
 0x1d0   :  { %v247_v28 = vpop.f32.mrf.mxu1 }
 0x1d1   :  { %v251_v29 = vpack.c.bf16 %v250_v27, %v250_v27 }
 0x1d2   :  { %v413_v30 = vpop.f32.mrf.mxu1 }
 0x1d3   :  { %423 = vmatmul.mubr.msk.bf16.vlgmr.msra.gmra.mxu0 %vm122_vm1, %v251_v29 }
 0x293   :  { %v328_v32 = vpop.f32.mrf.mxu0 }
 0x294   :  { %v329_v33 = vadd.f32 %v369_v31, %v328_v32 }
 0x295   :  { %v424_v34 = vpop.f32.mrf.mxu0 }
 0x296   :  { %447 = vtanh.f32 %v329_v33 }
 0x297   :  { %v331_v35 = vpop.f32.mrf.mxu0 }
 0x299   :  { %v425_v36 = vpop.f32.mrf.mxu0 }
 0x2a3   :  { %v448_v39 = vpop.eup %447 }
 0x2a4   :  { %v338_v40 = vsel %vm336_vm2, %v448_v39, %v329_v33 }
 0x2a5   :  { %339 = vst [vmem:[#allocation10] sm:$0xff] %v338_v40 }
 0x2a6   :  { %540 = shalt.err (!%p537_p10)
}
 0x2a7   :  { %349 = dma.vmem_to_hbm [thread:$0]  %s347_s24, 128, %s652_s7, [#allocation4]  }
 0x2a8   :  { %555 = dma.done.wait [#allocation4], 128  }
 0x2a9   :  { %556 = vsyncadd [#allocation4], 4294967168 }
 0x2aa   :  { %353 = vsyncpa [#allocation3], 1 }
 0x2ab   :  { %354 = vsyncpa [#allocation6], 1 }
 0x2ac   :  { %355 = vsyncpa [#allocation9], 1 }
 0x2ad   :  { %356 = vsyncpa [#allocation4], 1 }

</bundles_post_ra>
